<compile_context>
chip_gen: v5e
topology: v5e:2x2
jax: 0.10.0
libtpu: 0.0.40
codegen_flags: <defaults>
</compile_context>

<pallas_src>
import functools

import jax
import jax.numpy as jnp
from jax.experimental import pallas as pl
from jax.experimental.pallas import tpu as pltpu


def _vmem_capacity_bytes() -> int:
    """VMEM capacity of the local TPU; conservative (v7x) fallback if the query fails."""
    try:
        return int(pltpu.get_tpu_info().vmem_capacity_bytes)
    except Exception:
        return 64 * 1024 * 1024


def _soft_target_kernel(s_ref, t_ref, o_ref, *, inv_T, scale, tile_rows, batch,
                        tiles_per_split, needs_mask):
    p = pl.program_id(0)   # "parallel" split axis (megacore on v7x)
    i = pl.program_id(1)   # "arbitrary" batch-tile axis within the split

    @pl.when(i == 0)
    def _init():
        o_ref[...] = jnp.zeros_like(o_ref)

    # Cast + temperature scaling (multiply, not divide); all math in f32.
    s = s_ref[...].astype(jnp.float32) * inv_T
    t = t_ref[...].astype(jnp.float32) * inv_T

    # log_softmax(student): per-row log-sum-exp. Logs stay per-row (no per-element log).
    s_max = jnp.max(s, axis=1, keepdims=True)
    s_shift = s - s_max
    z_s = jnp.sum(jnp.exp(s_shift), axis=1, keepdims=True)
    log_z_s = jnp.log(z_s)

    # softmax(teacher): reuse exp(t_shift) for both the row sum and p_t.
    t_max = jnp.max(t, axis=1, keepdims=True)
    t_shift = t - t_max
    exp_t = jnp.exp(t_shift)
    z_t = jnp.sum(exp_t, axis=1, keepdims=True)
    log_z_t = jnp.log(z_t)
    # Per-row reciprocal on the EUP + per-element multiply instead of a per-element divide.
    p_t = exp_t * pl.reciprocal(z_t, approx=True)

    # KL(p_t || p_s) per element without materializing log_p_t / log_p_s:
    #   log_p_t - log_p_s = (t_shift - s_shift) - (log_z_t - log_z_s)
    kl = p_t * ((t_shift - s_shift) - (log_z_t - log_z_s))

    if needs_mask:
        # Zero out padded rows of the (possibly ragged) last tile.
        row0 = (p * tiles_per_split + i) * tile_rows
        rows = row0 + jax.lax.broadcasted_iota(jnp.int32, kl.shape, 0)
        kl = jnp.where(rows < batch, kl, 0.0)

    # Accumulate into the resident output block (same block for every i of this split).
    o_ref[...] += jnp.sum(kl)

    @pl.when(i == pl.num_programs(1) - 1)
    def _finalize():
        # 'batchmean' and the T*T factor.
        o_ref[...] = o_ref[...] * scale


def soft_target_loss(out_s: jax.Array, out_t: jax.Array, T: float, *,
                     block_rows: int | None = None) -> jax.Array:
    """SoftTarget KD loss. `out_s`, `out_t`: [B, C] logits (f32 or bf16; bf16 halves DMA)."""
    assert out_s.shape == out_t.shape and out_s.ndim == 2
    assert out_s.dtype == out_t.dtype
    B, C = out_s.shape
    itemsize = jnp.dtype(out_s.dtype).itemsize

    # Generation-aware VMEM budgeting: 3/4 of physical VMEM (=> ~48 MiB on v7x, ~96 MiB on
    # v5e/v6e), set explicitly so we do not rely on the small scoped default.
    vmem_cap = _vmem_capacity_bytes()
    vmem_limit = (3 * vmem_cap) // 4
    tile_budget = vmem_limit - (2 << 20)           # slack for output blocks / internal scratch

    # Pick the largest batch tile that fits: 2 inputs x 2 pipeline buffers x TB x C x itemsize.
    if block_rows is None:
        tb = (tile_budget // (2 * 2 * C * itemsize)) // 8 * 8
        tb = max(8, min(tb, 2048))
    else:
        tb = max(8, (block_rows // 8) * 8)
    if tb >= B:
        tb = B                                     # single full-batch block (full dim is legal)
        n_tiles = 1
    else:
        n_tiles = pl.cdiv(B, tb)

    # Leading "parallel" split: 2 partial sums (one per TensorCore on v7x), summed in the wrapper.
    n_split = 2 if (n_tiles >= 2 and n_tiles % 2 == 0) else 1
    tiles_per_split = n_tiles // n_split

    kernel = functools.partial(
        _soft_target_kernel,
        inv_T=1.0 / float(T),
        scale=float(T) * float(T) / float(B),
        tile_rows=tb,
        batch=B,
        tiles_per_split=tiles_per_split,
        needs_mask=(B % tb != 0),
    )

    # Output: one lane-dense (8, 128) accumulator block per split (every element of split p's
    # block ends up holding that split's scaled partial loss).
    out = pl.pallas_call(
        kernel,
        out_shape=jax.ShapeDtypeStruct((n_split * 8, 128), jnp.float32),
        grid_spec=pltpu.PrefetchScalarGridSpec(
            num_scalar_prefetch=0,
            grid=(n_split, tiles_per_split),
            in_specs=[
                pl.BlockSpec((tb, C), lambda p, i: (p * tiles_per_split + i, 0)),
                pl.BlockSpec((tb, C), lambda p, i: (p * tiles_per_split + i, 0)),
            ],
            out_specs=pl.BlockSpec((8, 128), lambda p, i: (p, 0)),
        ),
        compiler_params=pltpu.CompilerParams(
            dimension_semantics=("parallel", "arbitrary"),
            vmem_limit_bytes=int(vmem_limit),
        ),
    )(out_s, out_t)

    # One representative element per split's block; sum the per-split partials.
    return jnp.sum(out[::8, 0])


class STandNST:
    """Pallas port of kd_losses/STandNST.STandNST (forward pass)."""

    def __init__(self, T):
        self.T = T

    def __call__(self, fm_s, fm_t, flag):
        if flag == 0:
            # TODO(synk): NSTa branch (poly-kernel MMD + np.cov covariance + pandas skew) relies
            # on host-side numpy/pandas statistics; not ported to Pallas.
            raise NotImplementedError("NSTa (flag == 0) branch is not ported to Pallas.")
        return soft_target_loss(fm_s, fm_t, self.T)


def _reference_loss(out_s, out_t, T):
    s = out_s.astype(jnp.float32) / T
    t = out_t.astype(jnp.float32) / T
    log_p_s = jax.nn.log_softmax(s, axis=1)
    p_t = jax.nn.softmax(t, axis=1)
    log_p_t = jax.nn.log_softmax(t, axis=1)
    return jnp.sum(p_t * (log_p_t - log_p_s)) / out_s.shape[0] * T * T


if __name__ == "__main__":
    T = 4.0
    key = jax.random.PRNGKey(0)

    # Small logits consistent with SoftTarget: [batch, classes].
    B, C = 8, 32
    k1, k2 = jax.random.split(key)
    out_s = jax.random.normal(k1, (B, C), dtype=jnp.float32)
    out_t = jax.random.normal(k2, (B, C), dtype=jnp.float32)
    loss = jax.block_until_ready(STandNST(T)(out_s, out_t, 1))
    ref = jax.block_until_ready(_reference_loss(out_s, out_t, T))
    assert jnp.allclose(loss, ref, rtol=1e-2, atol=1e-5), (loss, ref)

    # Exercise the tiled + ragged-mask + 2-way-split path with a forced small tile.
    B2, C2 = 44, 160   # 6 tiles of 8 rows (last one ragged), 2 parallel splits of 3 tiles
    k3, k4 = jax.random.split(k2)
    s2 = jax.random.normal(k3, (B2, C2), dtype=jnp.float32)
    t2 = jax.random.normal(k4, (B2, C2), dtype=jnp.float32)
    loss2 = jax.block_until_ready(soft_target_loss(s2, t2, T, block_rows=8))
    ref2 = jax.block_until_ready(_reference_loss(s2, t2, T))
    assert jnp.allclose(loss2, ref2, rtol=1e-2, atol=1e-5), (loss2, ref2)

    # bf16 logits pass straight through (halves HBM bytes); kernel casts to f32 internally.
    s2_bf16 = s2.astype(jnp.bfloat16)
    t2_bf16 = t2.astype(jnp.bfloat16)
    loss_bf16 = jax.block_until_ready(soft_target_loss(s2_bf16, t2_bf16, T, block_rows=8))
    ref_bf16 = jax.block_until_ready(_reference_loss(s2_bf16, t2_bf16, T))
    assert jnp.allclose(loss_bf16, ref_bf16, rtol=2e-2, atol=1e-3), (loss_bf16, ref_bf16)

    print("KERNEL_OK")
</pallas_src>

<mosaic_0001>
module attributes {stable_mosaic.version = 11 : i64} {
  func.func @_soft_target_kernel(%arg0: i32, %arg1: i32, %arg2: memref<8x32xf32, #tpu.memory_space<vmem>>, %arg3: memref<8x32xf32, #tpu.memory_space<vmem>>, %arg4: memref<8x128xf32, #tpu.memory_space<vmem>>) attributes {dimension_semantics = [#tpu.dimension_semantics<parallel>, #tpu.dimension_semantics<arbitrary>], iteration_bounds = array<i64: 1, 1>, scalar_prefetch = 0 : i64, scratch_operands = 0 : i64, tpu.core_type = #tpu.core_type<tc>, window_params = [{transform_indices = @transform_0, window_bounds = array<i64: 8, 32>}, {transform_indices = @transform_1, window_bounds = array<i64: 8, 32>}, {transform_indices = @transform_2, window_bounds = array<i64: 8, 128>}]} {
    %c0_i32 = arith.constant 0 : i32
    %0 = arith.cmpi eq, %arg1, %c0_i32 : i32
    %1 = arith.extui %0 : i1 to i32
    %c0_i32_0 = arith.constant 0 : i32
    %2 = arith.cmpi ne, %1, %c0_i32_0 : i32
    scf.if %2 {
      %cst_16 = arith.constant 0.000000e+00 : f32
      %44 = vector.broadcast %cst_16 : f32 to vector<8x128xf32>
      %c0_17 = arith.constant 0 : index
      %c0_18 = arith.constant 0 : index
      %45 = vector.load %arg4[%c0_17, %c0_18] : memref<8x128xf32, #tpu.memory_space<vmem>>, vector<8x128xf32>
      tpu.vector_store %arg4[%c0_17, %c0_18], %44 {strides = array<i32>} : memref<8x128xf32, #tpu.memory_space<vmem>>, vector<8x128xf32>,
    } else {
    }
    %c0 = arith.constant 0 : index
    %c0_1 = arith.constant 0 : index
    %3 = vector.load %arg2[%c0, %c0_1] : memref<8x32xf32, #tpu.memory_space<vmem>>, vector<8x32xf32>
    %cst = arith.constant 2.500000e-01 : f32
    %4 = vector.broadcast %cst : f32 to vector<8x32xf32>
    %5 = arith.mulf %3, %4 : vector<8x32xf32>
    %c0_2 = arith.constant 0 : index
    %c0_3 = arith.constant 0 : index
    %6 = vector.load %arg3[%c0_2, %c0_3] : memref<8x32xf32, #tpu.memory_space<vmem>>, vector<8x32xf32>
    %cst_4 = arith.constant 2.500000e-01 : f32
    %7 = vector.broadcast %cst_4 : f32 to vector<8x32xf32>
    %8 = arith.mulf %6, %7 : vector<8x32xf32>
    %cst_5 = arith.constant dense<0xFF800000> : vector<8xf32>
    %9 = vector.multi_reduction <maximumf>, %5, %cst_5 [1] : vector<8x32xf32> to vector<8xf32>
    %10 = vector.shape_cast %9 : vector<8xf32> to vector<8x1xf32>
    %11 = vector.broadcast %10 : vector<8x1xf32> to vector<8x32xf32>
    %12 = arith.subf %5, %11 : vector<8x32xf32>
    %13 = math.exp %12 : vector<8x32xf32>
    %cst_6 = arith.constant dense<0.000000e+00> : vector<8xf32>
    %14 = vector.multi_reduction <add>, %13, %cst_6 [1] : vector<8x32xf32> to vector<8xf32>
    %15 = vector.shape_cast %14 : vector<8xf32> to vector<8x1xf32>
    %16 = math.log %15 : vector<8x1xf32>
    %cst_7 = arith.constant dense<0xFF800000> : vector<8xf32>
    %17 = vector.multi_reduction <maximumf>, %8, %cst_7 [1] : vector<8x32xf32> to vector<8xf32>
    %18 = vector.shape_cast %17 : vector<8xf32> to vector<8x1xf32>
    %19 = vector.broadcast %18 : vector<8x1xf32> to vector<8x32xf32>
    %20 = arith.subf %8, %19 : vector<8x32xf32>
    %21 = math.exp %20 : vector<8x32xf32>
    %cst_8 = arith.constant dense<0.000000e+00> : vector<8xf32>
    %22 = vector.multi_reduction <add>, %21, %cst_8 [1] : vector<8x32xf32> to vector<8xf32>
    %23 = vector.shape_cast %22 : vector<8xf32> to vector<8x1xf32>
    %24 = math.log %23 : vector<8x1xf32>
    %25 = tpu.reciprocal %23 {approx = true} : vector<8x1xf32> -> vector<8x1xf32>
    %26 = vector.broadcast %25 : vector<8x1xf32> to vector<8x32xf32>
    %27 = arith.mulf %21, %26 : vector<8x32xf32>
    %28 = arith.subf %20, %12 : vector<8x32xf32>
    %29 = arith.subf %24, %16 : vector<8x1xf32>
    %30 = vector.broadcast %29 : vector<8x1xf32> to vector<8x32xf32>
    %31 = arith.subf %28, %30 : vector<8x32xf32>
    %32 = arith.mulf %27, %31 : vector<8x32xf32>
    %c0_9 = arith.constant 0 : index
    %c0_10 = arith.constant 0 : index
    %33 = vector.load %arg4[%c0_9, %c0_10] : memref<8x128xf32, #tpu.memory_space<vmem>>, vector<8x128xf32>
    %34 = vector.shape_cast %32 : vector<8x32xf32> to vector<1x8x32xf32>
    %cst_11 = arith.constant dense<0.000000e+00> : vector<1xf32>
    %35 = vector.multi_reduction <add>, %34, %cst_11 [1, 2] : vector<1x8x32xf32> to vector<1xf32>
    %36 = vector.shape_cast %35 : vector<1xf32> to vector<1x1x1xf32>
    %37 = vector.extract %36[0, 0, 0] : f32 from vector<1x1x1xf32>
    %38 = vector.broadcast %37 : f32 to vector<8x128xf32>
    %39 = arith.addf %33, %38 : vector<8x128xf32>
    %c0_12 = arith.constant 0 : index
    %c0_13 = arith.constant 0 : index
    %40 = vector.load %arg4[%c0_12, %c0_13] : memref<8x128xf32, #tpu.memory_space<vmem>>, vector<8x128xf32>
    tpu.vector_store %arg4[%c0_12, %c0_13], %39 {strides = array<i32>} : memref<8x128xf32, #tpu.memory_space<vmem>>, vector<8x128xf32>,
    %c0_i32_14 = arith.constant 0 : i32
    %41 = arith.cmpi eq, %arg1, %c0_i32_14 : i32
    %42 = arith.extui %41 : i1 to i32
    %c0_i32_15 = arith.constant 0 : i32
    %43 = arith.cmpi ne, %42, %c0_i32_15 : i32
    scf.if %43 {
      %c0_16 = arith.constant 0 : index
      %c0_17 = arith.constant 0 : index
      %44 = vector.load %arg4[%c0_16, %c0_17] : memref<8x128xf32, #tpu.memory_space<vmem>>, vector<8x128xf32>
      %cst_18 = arith.constant 2.000000e+00 : f32
      %45 = vector.broadcast %cst_18 : f32 to vector<8x128xf32>
      %46 = arith.mulf %44, %45 : vector<8x128xf32>
      %c0_19 = arith.constant 0 : index
      %c0_20 = arith.constant 0 : index
      %47 = vector.load %arg4[%c0_19, %c0_20] : memref<8x128xf32, #tpu.memory_space<vmem>>, vector<8x128xf32>
      tpu.vector_store %arg4[%c0_19, %c0_20], %46 {strides = array<i32>} : memref<8x128xf32, #tpu.memory_space<vmem>>, vector<8x128xf32>,
    } else {
    }
    return
  }
  func.func @transform_0(%arg0: i32, %arg1: i32) -> (i32, i32) {
    %c1_i32 = arith.constant 1 : i32
    %0 = arith.muli %arg0, %c1_i32 : i32
    %1 = arith.addi %0, %arg1 : i32
    %c0_i32 = arith.constant 0 : i32
    %c0_i32_0 = arith.constant 0 : i32
    return %1, %c0_i32 : i32, i32
  }
  func.func @transform_1(%arg0: i32, %arg1: i32) -> (i32, i32) {
    %c1_i32 = arith.constant 1 : i32
    %0 = arith.muli %arg0, %c1_i32 : i32
    %1 = arith.addi %0, %arg1 : i32
    %c0_i32 = arith.constant 0 : i32
    %c0_i32_0 = arith.constant 0 : i32
    return %1, %c0_i32 : i32, i32
  }
  func.func @transform_2(%arg0: i32, %arg1: i32) -> (i32, i32) {
    %c0_i32 = arith.constant 0 : i32
    %c0_i32_0 = arith.constant 0 : i32
    return %arg0, %c0_i32 : i32, i32
  }
}

</mosaic_0001>

<bundles_post_ra>
// kernel: tpu_custom_call.1
= control target key start
LH: loop header
LB: loop body
LE: loop exit
PB: predicated region body
PF: predicated region fallthrough
CT: control target
= control target key end

     0   :  { %7 = vsyncpa [#allocation3], 0  ;;  %s250_s0 = inlined_call_operand.hbm [shape: f32[8,32], index: 0, kind: input, shape index: {}]   ;;  %s251_s1 = inlined_call_operand.hbm [shape: f32[8,32], index: 1, kind: input, shape index: {}]   ;;  %s252_s2 = inlined_call_operand.hbm [shape: f32[8,128], index: 2, kind: output, shape index: {}]  }
   0x1   :  { %8 = vsyncpa [#allocation6], 0 }
   0x2   :  { %9 = vsyncpa [#allocation4], 0  ;;  %s18_s11 = sshll.u32 %s250_s0, 4  ;;  %s218_s12 = smov [#allocation2]   ;;  %s19_s11 = int_to_ptr.hbm [resolvable:$true] %s18_s11 }
   0x3   :  { %s20_s13 = sshll.u32 %s218_s12, 4  ;;  %s32_s16 = sshll.u32 %s251_s1, 4  ;;  %s21_s13 = int_to_ptr.vmem [resolvable:$true] %s20_s13  ;;  %s33_s16 = int_to_ptr.hbm [resolvable:$true] %s32_s16 }
   0x4   :  { %23 = dma.hbm_to_vmem [thread:$0]  %s19_s11, 128, %s21_s13, [#allocation3]  }
   0x5   :  { %s219_s17 = smov [#allocation5]  }
   0x6   :  { %s34_s18 = sshll.u32 %s219_s17, 4  ;;  %s35_s18 = int_to_ptr.vmem [resolvable:$true] %s34_s18 }
   0x7   :  { %37 = dma.hbm_to_vmem [thread:$0]  %s33_s16, 128, %s35_s18, [#allocation6]  }
   0x8   :  { %212 = dma.done.wait [#allocation3], 128  }
   0x9   :  { %213 = vsyncadd [#allocation3], 4294967168 }
   0xa   :  { %214 = dma.done.wait [#allocation6], 128  }
   0xb   :  { %215 = vsyncadd [#allocation6], 4294967168  ;;  %v53_v0 = vld [vmem:[#allocation2] sm:$0xff]  ;;  %vm57_vm0 = vcmask 261120   ;;  %v55_v2 = vld [vmem:[#allocation5] sm:$0xff]  ;;  %s220_s1 = smov [#allocation7]  }
   0xc   :  { %v54_v1 = vmul.f32 0.25, %v53_v0  ;;  %v56_v4 = vmul.f32 0.25, %v55_v2  ;;  %s111_s19 = sshll.u32 %s220_s1, 4  ;;  %s113_s22 = sshll.u32 %s252_s2, 4  ;;  %s112_s19 = int_to_ptr.vmem [resolvable:$true] %s111_s19  ;;  %s114_s22 = int_to_ptr.hbm [resolvable:$true] %s113_s22 }
   0xe   :  { %v58_v3 = vsel %vm57_vm0, %v54_v1, -inf  ;;  %v69_v5 = vsel %vm57_vm0, %v56_v4, -inf }
   0xf   :  { %59 = vmax.xlane.f32.xlu0 %v58_v3 }
  0x17   :  { %70 = vmax.xlane.f32.xlu0 %v69_v5 }
  0x82   :  { %v60_v6 = vpop.xlane.xlu0 %59 }
  0x83   :  { %v61_v7 = vsub.f32 %v54_v1, %v60_v6 }
  0x85   :  { %v62_v8 = vmul.f32 1.442695, %v61_v7 }
  0x87   :  { %130 = vpow2.f32 %v62_v8 }
  0x8a   :  { %v71_v9 = vpop.xlane.xlu0 %70 }
  0x8b   :  { %v72_v10 = vsub.f32 %v56_v4, %v71_v9 }
  0x8d   :  { %v131_v11 = vpop.eup %130  ;;  %v73_v12 = vmul.f32 1.442695, %v72_v10  ;;  %v82_v13 = vsub.f32 %v72_v10, %v61_v7 }
  0x8e   :  { %v64_v14 = vsel %vm57_vm0, %v131_v11, 0.0 }
  0x8f   :  { %132 = vpow2.f32 %v73_v12  ;;  %65 = vadd.xlane.f32.xlu1 %v64_v14 }
  0x95   :  { %v133_v15 = vpop.eup %132 }
  0x96   :  { %v75_v16 = vsel %vm57_vm0, %v133_v15, 0.0 }
  0x97   :  { %76 = vadd.xlane.f32.xlu1 %v75_v16 }
 0x102   :  { %v66_v17 = vpop.xlane.xlu1 %65 }
 0x103   :  { %134 = vlog2.f32 %v66_v17 }
 0x109   :  { %v135_v19 = vpop.eup %134 }
 0x10a   :  { %v77_v18 = vpop.xlane.xlu1 %76  ;;  %v68_v21 = vmul.f32 0.6931472, %v135_v19 }
 0x10b   :  { %136 = vlog2.f32 %v77_v18 }
 0x10c   :  { %138 = vrcp.f32 %v77_v18 }
 0x111   :  { %v137_v20 = vpop.eup %136 }
 0x112   :  { %v79_v22 = vmul.f32 0.6931472, %v137_v20  ;;  %v139_v23 = vpop.eup %138 }
 0x113   :  { %v81_v25 = vmul.f32 %v139_v23, %v133_v15 }
 0x114   :  { %v83_v24 = vsub.f32 %v79_v22, %v68_v21 }
 0x116   :  { %v84_v26 = vsub.f32 %v82_v13, %v83_v24 }
 0x118   :  { %v85_v27 = vmul.f32 %v84_v26, %v81_v25 }
 0x11a   :  { %v87_v28 = vsel %vm57_vm0, %v85_v27, 0.0 }
 0x11b   :  { %88 = vadd.xlane.f32.xlu2 %v87_v28 }
 0x18e   :  { %v89_v29 = vpop.xlane.xlu2 %88 }
 0x18f   :  { %v90_v30 = vrot.slane %v89_v29, 4 }
 0x191   :  { %v91_v31 = vadd.f32 %v90_v30, %v89_v29 }
 0x193   :  { %v92_v32 = vrot.slane %v91_v31, 2 }
 0x195   :  { %v93_v33 = vadd.f32 %v92_v32, %v91_v31 }
 0x197   :  { %v94_v34 = vrot.slane %v93_v33, 1 }
 0x199   :  { %v95_v35 = vadd.f32 %v94_v34, %v93_v33 }
 0x19b   :  { %124 = vpush %v95_v35 }
 0x1cc   :  { %s125_s0 = spop %124 }
 0x1cd   :  { %v97_v36 = vstv %s125_s0 }
 0x1ce   :  { %v104_v37 = vmul.f32 2.0, %v97_v36 }
 0x1d0   :  { %105 = vst [vmem:[#allocation7] sm:$0xff] %v104_v37 }
 0x1d1   :  { %116 = dma.vmem_to_hbm [thread:$0]  %s112_s19, 128, %s114_s22, [#allocation4]  }
 0x1d2   :  { %216 = dma.done.wait [#allocation4], 128  }
 0x1d3   :  { %217 = vsyncadd [#allocation4], 4294967168 }
 0x1d4   :  { %121 = vsyncpa [#allocation3], 1 }
 0x1d5   :  { %122 = vsyncpa [#allocation6], 1 }
 0x1d6   :  { %123 = vsyncpa [#allocation4], 1 }

</bundles_post_ra>
